<compile_context>
chip_gen: v7x
topology: tpu7x:2x2x1
jax: 0.10.0
libtpu: 0.0.40
codegen_flags: <defaults>
</compile_context>

<pallas_src>
import functools

import jax
import jax.numpy as jnp
from jax.experimental import pallas as pl
from jax.experimental.pallas import tpu as pltpu

PRIOR_SCALE = 0.1
_H_CHUNK = 1024  # hidden-axis chunk for large fused hidden sizes


def _round_up(n, m):
    return ((n + m - 1) // m) * m


def _vmem_limit_bytes():
    """Generation-aware scoped-VMEM limit (≈100 MiB on 128 MiB parts, 48 MiB on v7x)."""
    cap = 64 * 1024 * 1024  # conservative default (v7x) if query fails
    try:
        cap = int(pltpu.get_tpu_info().vmem_capacity_bytes)
    except Exception:
        pass
    return max(32 * 1024 * 1024, min(cap - 16 * 1024 * 1024, 100 * 1024 * 1024))


def _select_tb(b_pad, vmem_limit):
    """Batch tile: multiple of 16; single step for tiny B; >=2 steps otherwise."""
    tb_max = 1024 if vmem_limit >= 80 * 1024 * 1024 else 512
    if b_pad <= 32:                      # overhead-bound toy sizes: one grid step
        return b_pad
    if b_pad <= tb_max:                  # ensure >=2 steps so v7x's 2 TCs both work
        return _round_up((b_pad + 1) // 2, 16)
    return tb_max


def _fused_mlp_kernel(x_ref, w1_ref, b1_ref, w2_ref, b2_ref, o_ref, *,
                      n_h_chunks, h_chunk):
    # In-kernel bf16 cast of the streamed x tile (VALU work hidden under MXU).
    x = x_ref[...].astype(jnp.bfloat16)

    if n_h_chunks == 1:
        h = jnp.dot(x, w1_ref[...], preferred_element_type=jnp.float32)
        h = jnp.maximum(h + b1_ref[...], 0.0)
        y = jnp.dot(h.astype(jnp.bfloat16), w2_ref[...],
                    preferred_element_type=jnp.float32)
    else:
        # Chunk the fused hidden axis: bounds the live (TB, chunk) intermediate.
        def body(c, acc):
            start = pl.multiple_of(c * h_chunk, h_chunk)
            hc = jnp.dot(x, w1_ref[:, pl.ds(start, h_chunk)],
                         preferred_element_type=jnp.float32)
            hc = jnp.maximum(hc + b1_ref[:, pl.ds(start, h_chunk)], 0.0)
            return acc + jnp.dot(hc.astype(jnp.bfloat16),
                                 w2_ref[pl.ds(start, h_chunk), :],
                                 preferred_element_type=jnp.float32)

        y = jax.lax.fori_loop(
            0, n_h_chunks, body,
            jnp.zeros((x.shape[0], o_ref.shape[-1]), jnp.float32))

    # f32 accumulate, bf16 store (halves writeback DMA / store-slot pressure).
    o_ref[...] = (y + b2_ref[...]).astype(o_ref.dtype)


def fuse_prior_params(base_params, prior_params, prior_scale=PRIOR_SCALE):
    """Fuse base+prior MLPs into one MLP.  Call ONCE at init, not per forward."""
    w1b, b1b, w2b, b2b = base_params
    # PyTorch detaches the prior output; stop_gradient on the prior params keeps
    # grads out of the prior weights in the fused formulation.
    # TODO(synk): grads w.r.t. x through the prior branch are not blocked by the
    # fusion and the pallas_call has no custom VJP — intended for forward-only use.
    w1p, b1p, w2p, b2p = jax.tree_util.tree_map(jax.lax.stop_gradient,
                                                tuple(prior_params))

    d_out = w2b.shape[1]
    d_out_p = _round_up(max(d_out, 128), 128)   # lane-dense output -> unmasked vst

    w1 = jnp.concatenate([w1b, w1p], axis=1).astype(jnp.bfloat16)     # [D_in, 2H]
    b1 = jnp.concatenate([b1b, b1p], axis=1).astype(jnp.float32)      # [1, 2H]
    w2 = jnp.concatenate([w2b, prior_scale * w2p], axis=0)            # [2H, D_out]
    b2 = (b2b + prior_scale * b2p).astype(jnp.float32)                # [1, D_out]
    if d_out_p != d_out:
        w2 = jnp.pad(w2, ((0, 0), (0, d_out_p - d_out)))
        b2 = jnp.pad(b2, ((0, 0), (0, d_out_p - d_out)))
    w2 = w2.astype(jnp.bfloat16)
    return (w1, b1, w2, b2), d_out


def model_with_prior_forward(x, fused_params, d_out, *, out_dtype=jnp.bfloat16):
    """x: [B, D_in] f32.  fused_params from fuse_prior_params().  Returns [B, d_out]."""
    w1, b1, w2, b2 = fused_params
    B, d_in = x.shape
    two_h = w1.shape[1]
    d_out_p = w2.shape[1]

    vmem_limit = _vmem_limit_bytes()

    # Batch tiling (multiples of 16 for bf16 (16,128) output packing).
    B_pad = _round_up(B, 16)
    TB = _select_tb(B_pad, vmem_limit)
    B_pad = _round_up(B_pad, TB)
    if B_pad != B:
        # Padded rows produce relu(b1)@w2+b2 garbage; they are sliced off below
        # and must never be consumed before the slice.
        x = jnp.pad(x, ((0, B_pad - B), (0, 0)))

    # Hidden-axis chunking for large fused hidden sizes.
    if two_h > _H_CHUNK and two_h % _H_CHUNK == 0:
        n_h_chunks, h_chunk = two_h // _H_CHUNK, _H_CHUNK
    else:
        n_h_chunks, h_chunk = 1, two_h
    # TODO(synk): large 2H not divisible by _H_CHUNK falls back to the unchunked
    # path; zero-pad the fused hidden axis at fusion time if that ever matters.

    kernel = functools.partial(_fused_mlp_kernel,
                               n_h_chunks=n_h_chunks, h_chunk=h_chunk)

    def call(single_buffer_weights):
        if single_buffer_weights:
            def resident(a):  # same block every step; single-buffered -> no 2x VMEM
                return pl.BlockSpec(a.shape, lambda i: (0,) * a.ndim,
                                    pipeline_mode=pl.Buffered(1))
        else:
            def resident(a):
                return pl.BlockSpec(a.shape, lambda i: (0,) * a.ndim)

        return pl.pallas_call(
            kernel,
            out_shape=jax.ShapeDtypeStruct((B_pad, d_out_p), out_dtype),
            grid_spec=pltpu.PrefetchScalarGridSpec(
                num_scalar_prefetch=0,
                grid=(B_pad // TB,),
                in_specs=[
                    pl.BlockSpec((TB, d_in), lambda i: (i, 0)),   # x streamed f32
                    resident(w1), resident(b1), resident(w2), resident(b2),
                ],
                out_specs=pl.BlockSpec((TB, d_out_p), lambda i: (i, 0)),
            ),
            compiler_params=pltpu.CompilerParams(
                dimension_semantics=("parallel",),   # shard batch steps across TCs on v7x
                vmem_limit_bytes=vmem_limit,
            ),
        )(x, w1, b1, w2, b2)

    try:
        out_padded = call(single_buffer_weights=True)
    except Exception:
        # Fallback for jax versions without BlockSpec pipeline_mode support.
        out_padded = call(single_buffer_weights=False)

    return out_padded[:B, :d_out]


def model_with_prior(x, base_params, prior_params, prior_scale=PRIOR_SCALE,
                     out_dtype=jnp.bfloat16):
    """Convenience wrapper (fuses per call). Prefer fusing once at init."""
    fused, d_out = fuse_prior_params(base_params, prior_params, prior_scale)
    return model_with_prior_forward(x, fused, d_out, out_dtype=out_dtype)


def _ref_forward(x, base_params, prior_params, prior_scale=PRIOR_SCALE):
    def mlp(x, p):
        w1, b1, w2, b2 = p
        h = jnp.maximum(x @ w1 + b1, 0.0)
        return h @ w2 + b2
    return mlp(x, base_params) + prior_scale * mlp(x, prior_params)


def _init_mlp_params(key, d_in, d_hidden, d_out):
    k1, k2, k3, k4 = jax.random.split(key, 4)
    w1 = jax.random.normal(k1, (d_in, d_hidden), jnp.float32) * 0.1
    b1 = jax.random.normal(k2, (1, d_hidden), jnp.float32) * 0.1
    w2 = jax.random.normal(k3, (d_hidden, d_out), jnp.float32) * 0.1
    b2 = jax.random.normal(k4, (1, d_out), jnp.float32) * 0.1
    return (w1, b1, w2, b2)


if __name__ == "__main__":
    key = jax.random.PRNGKey(0)
    kx, kb, kp = jax.random.split(key, 3)

    batch, d_in, d_hidden, d_out = 8, 16, 32, 8
    x = jax.random.normal(kx, (batch, d_in), jnp.float32)

    base_params = _init_mlp_params(kb, d_in, d_hidden, d_out)
    prior_params = _init_mlp_params(kp, d_in, d_hidden, d_out)

    # Weight fusion is hoisted out of the per-forward path: done once here.
    fused_params, d_out_real = fuse_prior_params(base_params, prior_params, PRIOR_SCALE)

    out = model_with_prior_forward(x, fused_params, d_out_real)
    out = jax.block_until_ready(out)

    ref = _ref_forward(x, base_params, prior_params)
    assert out.shape == (batch, d_out), out.shape
    # bf16 MXU inputs / bf16 output with f32 accumulation vs pure-f32 reference.
    max_err = jnp.max(jnp.abs(out.astype(jnp.float32) - ref))
    assert max_err < 2.5e-2, f"mismatch, max abs err {max_err}"

    print("KERNEL_OK")
</pallas_src>

<mosaic_0001>
module attributes {stable_mosaic.version = 11 : i64} {
  func.func @_fused_mlp_kernel(%arg0: i32, %arg1: memref<16x16xf32, #tpu.memory_space<vmem>>, %arg2: memref<16x64xbf16, #tpu.memory_space<vmem>>, %arg3: memref<1x64xf32, #tpu.memory_space<vmem>>, %arg4: memref<64x128xbf16, #tpu.memory_space<vmem>>, %arg5: memref<1x128xf32, #tpu.memory_space<vmem>>, %arg6: memref<16x128xbf16, #tpu.memory_space<vmem>>) attributes {dimension_semantics = [#tpu.dimension_semantics<parallel>], iteration_bounds = array<i64: 1>, scalar_prefetch = 0 : i64, scratch_operands = 0 : i64, tpu.core_type = #tpu.core_type<tc>, window_params = [{transform_indices = @transform_0, window_bounds = array<i64: 16, 16>}, {pipeline_mode = #tpu.pipeline_mode<synchronous>, transform_indices = @transform_1, window_bounds = array<i64: 16, 64>}, {pipeline_mode = #tpu.pipeline_mode<synchronous>, transform_indices = @transform_2, window_bounds = array<i64: 1, 64>}, {pipeline_mode = #tpu.pipeline_mode<synchronous>, transform_indices = @transform_3, window_bounds = array<i64: 64, 128>}, {pipeline_mode = #tpu.pipeline_mode<synchronous>, transform_indices = @transform_4, window_bounds = array<i64: 1, 128>}, {transform_indices = @transform_5, window_bounds = array<i64: 16, 128>}]} {
    %c0 = arith.constant 0 : index
    %c0_0 = arith.constant 0 : index
    %0 = vector.load %arg1[%c0, %c0_0] : memref<16x16xf32, #tpu.memory_space<vmem>>, vector<16x16xf32>
    %1 = arith.truncf %0 : vector<16x16xf32> to vector<16x16xbf16>
    %c0_1 = arith.constant 0 : index
    %c0_2 = arith.constant 0 : index
    %2 = vector.load %arg2[%c0_1, %c0_2] : memref<16x64xbf16, #tpu.memory_space<vmem>>, vector<16x64xbf16>
    %cst = arith.constant dense<0.000000e+00> : vector<16x64xf32>
    %3 = tpu.matmul %1, %2, %cst {dimension_numbers = #tpu.dot_dimension_numbers<[1], [0], [0], [1], [0, 0, 1, 1], [], []>} : vector<16x16xbf16>, vector<16x64xbf16>, vector<16x64xf32> -> vector<16x64xf32>
    %c0_3 = arith.constant 0 : index
    %c0_4 = arith.constant 0 : index
    %4 = vector.load %arg3[%c0_3, %c0_4] : memref<1x64xf32, #tpu.memory_space<vmem>>, vector<1x64xf32>
    %5 = vector.broadcast %4 : vector<1x64xf32> to vector<16x64xf32>
    %6 = arith.addf %3, %5 : vector<16x64xf32>
    %cst_5 = arith.constant 0.000000e+00 : f32
    %7 = vector.broadcast %cst_5 : f32 to vector<16x64xf32>
    %8 = arith.maximumf %6, %7 : vector<16x64xf32>
    %9 = arith.truncf %8 : vector<16x64xf32> to vector<16x64xbf16>
    %c0_6 = arith.constant 0 : index
    %c0_7 = arith.constant 0 : index
    %10 = vector.load %arg4[%c0_6, %c0_7] : memref<64x128xbf16, #tpu.memory_space<vmem>>, vector<64x128xbf16>
    %cst_8 = arith.constant dense<0.000000e+00> : vector<16x128xf32>
    %11 = tpu.matmul %9, %10, %cst_8 {dimension_numbers = #tpu.dot_dimension_numbers<[1], [0], [0], [1], [0, 0, 1, 1], [], []>} : vector<16x64xbf16>, vector<64x128xbf16>, vector<16x128xf32> -> vector<16x128xf32>
    %c0_9 = arith.constant 0 : index
    %c0_10 = arith.constant 0 : index
    %12 = vector.load %arg5[%c0_9, %c0_10] : memref<1x128xf32, #tpu.memory_space<vmem>>, vector<1x128xf32>
    %13 = vector.broadcast %12 : vector<1x128xf32> to vector<16x128xf32>
    %14 = arith.addf %11, %13 : vector<16x128xf32>
    %15 = arith.truncf %14 : vector<16x128xf32> to vector<16x128xbf16>
    %c0_11 = arith.constant 0 : index
    %c0_12 = arith.constant 0 : index
    %16 = vector.load %arg6[%c0_11, %c0_12] : memref<16x128xbf16, #tpu.memory_space<vmem>>, vector<16x128xbf16>
    tpu.vector_store %arg6[%c0_11, %c0_12], %15 {strides = array<i32>} : memref<16x128xbf16, #tpu.memory_space<vmem>>, vector<16x128xbf16>,
    return
  }
  func.func @transform_0(%arg0: i32) -> (i32, i32) {
    %c0_i32 = arith.constant 0 : i32
    %c0_i32_0 = arith.constant 0 : i32
    return %arg0, %c0_i32 : i32, i32
  }
  func.func @transform_1(%arg0: i32) -> (i32, i32) {
    %c0_i32 = arith.constant 0 : i32
    %c0_i32_0 = arith.constant 0 : i32
    %c0_i32_1 = arith.constant 0 : i32
    return %c0_i32, %c0_i32_0 : i32, i32
  }
  func.func @transform_2(%arg0: i32) -> (i32, i32) {
    %c0_i32 = arith.constant 0 : i32
    %c0_i32_0 = arith.constant 0 : i32
    %c0_i32_1 = arith.constant 0 : i32
    return %c0_i32, %c0_i32_0 : i32, i32
  }
  func.func @transform_3(%arg0: i32) -> (i32, i32) {
    %c0_i32 = arith.constant 0 : i32
    %c0_i32_0 = arith.constant 0 : i32
    %c0_i32_1 = arith.constant 0 : i32
    return %c0_i32, %c0_i32_0 : i32, i32
  }
  func.func @transform_4(%arg0: i32) -> (i32, i32) {
    %c0_i32 = arith.constant 0 : i32
    %c0_i32_0 = arith.constant 0 : i32
    %c0_i32_1 = arith.constant 0 : i32
    return %c0_i32, %c0_i32_0 : i32, i32
  }
  func.func @transform_5(%arg0: i32) -> (i32, i32) {
    %c0_i32 = arith.constant 0 : i32
    %c0_i32_0 = arith.constant 0 : i32
    return %arg0, %c0_i32 : i32, i32
  }
}

module attributes {stable_mosaic.version = 11 : i64} {
  func.func @_fused_mlp_kernel(%arg0: i32, %arg1: memref<16x16xf32, #tpu.memory_space<vmem>>, %arg2: memref<16x64xbf16, #tpu.memory_space<vmem>>, %arg3: memref<1x64xf32, #tpu.memory_space<vmem>>, %arg4: memref<64x128xbf16, #tpu.memory_space<vmem>>, %arg5: memref<1x128xf32, #tpu.memory_space<vmem>>, %arg6: memref<16x128xbf16, #tpu.memory_space<vmem>>) attributes {dimension_semantics = [#tpu.dimension_semantics<parallel>], iteration_bounds = array<i64: 1>, scalar_prefetch = 0 : i64, scratch_operands = 0 : i64, tpu.core_type = #tpu.core_type<tc>, window_params = [{transform_indices = @transform_0, window_bounds = array<i64: 16, 16>}, {pipeline_mode = #tpu.pipeline_mode<synchronous>, transform_indices = @transform_1, window_bounds = array<i64: 16, 64>}, {pipeline_mode = #tpu.pipeline_mode<synchronous>, transform_indices = @transform_2, window_bounds = array<i64: 1, 64>}, {pipeline_mode = #tpu.pipeline_mode<synchronous>, transform_indices = @transform_3, window_bounds = array<i64: 64, 128>}, {pipeline_mode = #tpu.pipeline_mode<synchronous>, transform_indices = @transform_4, window_bounds = array<i64: 1, 128>}, {transform_indices = @transform_5, window_bounds = array<i64: 16, 128>}]} {
    %c0 = arith.constant 0 : index
    %c0_0 = arith.constant 0 : index
    %0 = vector.load %arg1[%c0, %c0_0] : memref<16x16xf32, #tpu.memory_space<vmem>>, vector<16x16xf32>
    %1 = arith.truncf %0 : vector<16x16xf32> to vector<16x16xbf16>
    %c0_1 = arith.constant 0 : index
    %c0_2 = arith.constant 0 : index
    %2 = vector.load %arg2[%c0_1, %c0_2] : memref<16x64xbf16, #tpu.memory_space<vmem>>, vector<16x64xbf16>
    %cst = arith.constant dense<0.000000e+00> : vector<16x64xf32>
    %3 = tpu.matmul %1, %2, %cst {dimension_numbers = #tpu.dot_dimension_numbers<[1], [0], [0], [1], [0, 0, 1, 1], [], []>} : vector<16x16xbf16>, vector<16x64xbf16>, vector<16x64xf32> -> vector<16x64xf32>
    %c0_3 = arith.constant 0 : index
    %c0_4 = arith.constant 0 : index
    %4 = vector.load %arg3[%c0_3, %c0_4] : memref<1x64xf32, #tpu.memory_space<vmem>>, vector<1x64xf32>
    %5 = vector.broadcast %4 : vector<1x64xf32> to vector<16x64xf32>
    %6 = arith.addf %3, %5 : vector<16x64xf32>
    %cst_5 = arith.constant 0.000000e+00 : f32
    %7 = vector.broadcast %cst_5 : f32 to vector<16x64xf32>
    %8 = arith.maximumf %6, %7 : vector<16x64xf32>
    %9 = arith.truncf %8 : vector<16x64xf32> to vector<16x64xbf16>
    %c0_6 = arith.constant 0 : index
    %c0_7 = arith.constant 0 : index
    %10 = vector.load %arg4[%c0_6, %c0_7] : memref<64x128xbf16, #tpu.memory_space<vmem>>, vector<64x128xbf16>
    %cst_8 = arith.constant dense<0.000000e+00> : vector<16x128xf32>
    %11 = tpu.matmul %9, %10, %cst_8 {dimension_numbers = #tpu.dot_dimension_numbers<[1], [0], [0], [1], [0, 0, 1, 1], [], []>} : vector<16x64xbf16>, vector<64x128xbf16>, vector<16x128xf32> -> vector<16x128xf32>
    %c0_9 = arith.constant 0 : index
    %c0_10 = arith.constant 0 : index
    %12 = vector.load %arg5[%c0_9, %c0_10] : memref<1x128xf32, #tpu.memory_space<vmem>>, vector<1x128xf32>
    %13 = vector.broadcast %12 : vector<1x128xf32> to vector<16x128xf32>
    %14 = arith.addf %11, %13 : vector<16x128xf32>
    %15 = arith.truncf %14 : vector<16x128xf32> to vector<16x128xbf16>
    %c0_11 = arith.constant 0 : index
    %c0_12 = arith.constant 0 : index
    %16 = vector.load %arg6[%c0_11, %c0_12] : memref<16x128xbf16, #tpu.memory_space<vmem>>, vector<16x128xbf16>
    tpu.vector_store %arg6[%c0_11, %c0_12], %15 {strides = array<i32>} : memref<16x128xbf16, #tpu.memory_space<vmem>>, vector<16x128xbf16>,
    return
  }
  func.func @transform_0(%arg0: i32) -> (i32, i32) {
    %c0_i32 = arith.constant 0 : i32
    %c0_i32_0 = arith.constant 0 : i32
    return %arg0, %c0_i32 : i32, i32
  }
  func.func @transform_1(%arg0: i32) -> (i32, i32) {
    %c0_i32 = arith.constant 0 : i32
    %c0_i32_0 = arith.constant 0 : i32
    %c0_i32_1 = arith.constant 0 : i32
    return %c0_i32, %c0_i32_0 : i32, i32
  }
  func.func @transform_2(%arg0: i32) -> (i32, i32) {
    %c0_i32 = arith.constant 0 : i32
    %c0_i32_0 = arith.constant 0 : i32
    %c0_i32_1 = arith.constant 0 : i32
    return %c0_i32, %c0_i32_0 : i32, i32
  }
  func.func @transform_3(%arg0: i32) -> (i32, i32) {
    %c0_i32 = arith.constant 0 : i32
    %c0_i32_0 = arith.constant 0 : i32
    %c0_i32_1 = arith.constant 0 : i32
    return %c0_i32, %c0_i32_0 : i32, i32
  }
  func.func @transform_4(%arg0: i32) -> (i32, i32) {
    %c0_i32 = arith.constant 0 : i32
    %c0_i32_0 = arith.constant 0 : i32
    %c0_i32_1 = arith.constant 0 : i32
    return %c0_i32, %c0_i32_0 : i32, i32
  }
  func.func @transform_5(%arg0: i32) -> (i32, i32) {
    %c0_i32 = arith.constant 0 : i32
    %c0_i32_0 = arith.constant 0 : i32
    return %arg0, %c0_i32 : i32, i32
  }
}

</mosaic_0001>

<bundles_post_ra>
// kernel: tpu_custom_call.1
= control target key start
LH: loop header
LB: loop body
LE: loop exit
PB: predicated region body
PF: predicated region fallthrough
CT: control target
= control target key end

     0   :  { %10 = vsyncpa [#allocation3], 0  ;;  %s496_s0 = inlined_call_operand.hbm [shape: f32[16,16], index: 0, kind: input, shape index: {}]   ;;  %s497_s1 = inlined_call_operand.hbm [shape: bf16[16,64], index: 1, kind: input, shape index: {}]   ;;  %s498_s2 = inlined_call_operand.vmem [shape: f32[1,64], index: 2, kind: input, shape index: {}]   ;;  %s499_s3 = inlined_call_operand.hbm [shape: bf16[64,128], index: 3, kind: input, shape index: {}]   ;;  %s500_s4 = inlined_call_operand.vmem [shape: f32[1,128], index: 4, kind: input, shape index: {}]   ;;  %s501_s5 = inlined_call_operand.hbm [shape: bf16[16,128], index: 5, kind: output, shape index: {}]  }
   0x1   :  { %11 = vsyncpa [#allocation6], 0 }
   0x2   :  { %12 = vsyncpa [#allocation4], 0  ;;  %s393_s18 = smov [#allocation5]   ;;  %s299_s22 = scalar_lea.hbm %s497_s1, 128 }
   0x3   :  { %s30_s19 = sshll.u32 %s393_s18, 4  ;;  %p300_p0 = scmp.ne.s32.totalorder %s497_s1, %s299_s22  ;;  %s31_s19 = int_to_ptr.vmem [resolvable:$true] %s30_s19 }
   0x4   :  { %p303_p1 = scmp.lt.u32.totalorder %s299_s22, %s497_s1 }
   0x6   :  { %p305_p2 = pnand %p303_p1, %p300_p0 }
   0x8   :  { %308 = shalt.err (!%p305_p2)
}
   0x9   :  { %s309_s27 = scalar_lea.vmem %s31_s19, 128  ;;  %p314_p4 = scmp.lt.s32.totalorder %s31_s19, %s31_s19 }
   0xa   :  { %p310_p3 = scmp.ne.s32.totalorder %s31_s19, %s309_s27  ;;  %p315_p5 = scmp.lt.s32.totalorder %s309_s27, %s309_s27 }
   0xc   :  { %p316_p6 = por %p315_p5, %p314_p4 }
   0xe   :  { %p317_p7 = pnand %p316_p6, %p310_p3 }
  0x10   :  { %320 = shalt.err (!%p317_p7)
}
  0x11   :  { %s394_s28 = smov 64   ;;  %s395_s29 = smov 4  }
  0x12   :  { %36 = dma.hbm_to_vmem [thread:$0]  %s497_s1, 128, %s31_s19, [#allocation6], %s394_s28, %s394_s28, %s395_s29  }
  0x13   :  { %s396_s7 = smov [#allocation2]   ;;  %s321_s11 = scalar_lea.hbm %s496_s0, 256 }
  0x14   :  { %s18_s8 = sshll.u32 %s396_s7, 4  ;;  %p322_p8 = scmp.ne.s32.totalorder %s496_s0, %s321_s11  ;;  %s19_s8 = int_to_ptr.vmem [resolvable:$true] %s18_s8 }
  0x15   :  { %p325_p9 = scmp.lt.u32.totalorder %s321_s11, %s496_s0 }
  0x17   :  { %p327_p10 = pnand %p325_p9, %p322_p8 }
  0x19   :  { %330 = shalt.err (!%p327_p10)
}
  0x1a   :  { %s331_s16 = scalar_lea.vmem %s19_s8, 256  ;;  %p336_p12 = scmp.lt.s32.totalorder %s19_s8, %s19_s8 }
  0x1b   :  { %p332_p11 = scmp.ne.s32.totalorder %s19_s8, %s331_s16  ;;  %p337_p13 = scmp.lt.s32.totalorder %s331_s16, %s331_s16 }
  0x1d   :  { %p338_p0 = por %p337_p13, %p336_p12 }
  0x1f   :  { %p339_p1 = pnand %p338_p0, %p332_p11 }
  0x21   :  { %342 = shalt.err (!%p339_p1)
}
  0x22   :  { %s397_s1 = smov 128   ;;  %s398_s17 = smov 8  }
  0x23   :  { %24 = dma.hbm_to_vmem [thread:$0]  %s496_s0, 256, %s19_s8, [#allocation3], %s397_s1, %s397_s1, %s398_s17  }
  0x24   :  { %s399_s20 = smov [#allocation7]   ;;  %s343_s24 = scalar_lea.hbm %s499_s3, 512 }
  0x25   :  { %s44_s21 = sshll.u32 %s399_s20, 4  ;;  %p344_p2 = scmp.ne.s32.totalorder %s499_s3, %s343_s24  ;;  %s45_s21 = int_to_ptr.vmem [resolvable:$true] %s44_s21 }
  0x26   :  { %p347_p3 = scmp.lt.u32.totalorder %s343_s24, %s499_s3 }
  0x28   :  { %p349_p4 = pnand %p347_p3, %p344_p2 }
  0x2a   :  { %352 = shalt.err (!%p349_p4)
}
  0x2b   :  { %s353_s6 = scalar_lea.vmem %s45_s21, 512  ;;  %p358_p6 = scmp.lt.s32.totalorder %s45_s21, %s45_s21 }
  0x2c   :  { %p354_p5 = scmp.ne.s32.totalorder %s45_s21, %s353_s6  ;;  %p359_p7 = scmp.lt.s32.totalorder %s353_s6, %s353_s6 }
  0x2e   :  { %p360_p8 = por %p359_p7, %p358_p6 }
  0x30   :  { %p361_p9 = pnand %p360_p8, %p354_p5 }
  0x32   :  { %364 = shalt.err (!%p361_p9)
}
  0x33   :  { %50 = dma.hbm_to_vmem [thread:$0]  %s499_s3, 512, %s45_s21, [#allocation6], %s394_s28, %s394_s28, %s395_s29  }
  0x34   :  { %387 = dma.done.wait [#allocation3], 256  }
  0x35   :  { %388 = vsyncadd [#allocation3], 4294967040 }
  0x36   :  { %389 = dma.done.wait [#allocation6], 640  }
  0x37   :  { %390 = vsyncadd [#allocation6], 4294966656  ;;  %v400_v0 = vmov 0.0   ;;  %vm401_vm0 = vmmov 0   ;;  %v294_v1 = vld [vmem:[#allocation5] sm:$0xff]   ;;  %v63_v2 = vld [vmem:[#allocation2] sm:$0xff] }
  0x38   :  { %266 = vmatprep.subr.bf16.mxu0 %v400_v0  ;;  %268 = vmatprep.mubr.msk.bf16.mxu0 %vm401_vm0, %v400_v0  ;;  %v64_v3 = vld [vmem:[#allocation2 + $0x8] sm:$0xff]  ;;  %vm81_vm1 = vcmask 130048   ;;  %v295_v5 = vld [vmem:[#allocation7] sm:$0xff]   ;;  %v296_v6 = vld [vmem:[#allocation7 + $0x8] sm:$0xff]   ;;  %vm168_vm2 = vcmask 523264   ;;  %s402_s11 = smov [#allocation8]  }
  0x39   :  { %272 = vmatprep.subr.bf16.mxu1 %v400_v0  ;;  %280 = vmatprep.mubr.msk.bf16.mxu1 %vm401_vm0, %v400_v0  ;;  %v65_v4 = vpack.c.bf16 %v64_v3, %v63_v2  ;;  %v297_v7 = vld [vmem:[#allocation7 + $0x10] sm:$0xff]   ;;  %v298_v8 = vld [vmem:[#allocation7 + $0x18] sm:$0xff]   ;;  %v241_v9 = vld [vmem:[%s498_s2] ss:$0 sm:$0xff]  ;;  %s228_s2 = sshll.u32 %s402_s11, 4  ;;  %s229_s2 = int_to_ptr.vmem [resolvable:$true] %s228_s2 }
  0x3a   :  { %267 = vmatpush3.bf16.msra.mxu0 %v294_v1  ;;  %273 = vmatpush3.bf16.msra.mxu1 %v295_v5  ;;  %v244_v19 = vld [vmem:[%s500_s4] ss:$0 sm:$0xff]  ;;  %s365_s12 = scalar_lea.vmem %s229_s2, 128  ;;  %p370_p11 = scmp.lt.s32.totalorder %s229_s2, %s229_s2 }
  0x3b   :  { %274 = vmatprep.subr.bf16.mxu1 %v400_v0  ;;  %p366_p10 = scmp.ne.s32.totalorder %s229_s2, %s365_s12  ;;  %p371_p12 = scmp.lt.s32.totalorder %s365_s12, %s365_s12 }
  0x3d   :  { %269 = vmatmul.mubr.msk.bf16.vlgmr.msra.gmra.mrb[0].mxu0 %vm81_vm1, %v65_v4  ;;  %p372_p13 = por %p371_p12, %p370_p11 }
  0x3e   :  { %275 = vmatpush3.bf16.msra.mxu1 %v296_v6 }
  0x3f   :  { %276 = vmatprep.subr.bf16.mxu1 %v400_v0  ;;  %p373_p0 = pnand %p372_p13, %p366_p10 }
  0x42   :  { %277 = vmatpush3.bf16.msra.mxu1 %v297_v7 }
  0x43   :  { %278 = vmatprep.subr.bf16.mxu1 %v400_v0 }
  0x46   :  { %279 = vmatpush3.bf16.msra.mxu1 %v298_v8 }
 0x110   :  { %v119_v10 = vpop.f32.mrb[0].mxu0 }
 0x111   :  { %v120_v11 = vadd.f32 %v241_v9, %v119_v10  ;;  %v270_v12 = vpop.f32.mrb[1].mxu0 }
 0x112   :  { %v122_v13 = vpop.f32.mrb[2].mxu0 }
 0x113   :  { %v123_v14 = vadd.f32 %v241_v9, %v122_v13  ;;  %v271_v15 = vpop.f32.mrb[3].mxu0  ;;  %v126_v16 = vmax.f32 %v120_v11, 0.0 }
 0x115   :  { %v127_v17 = vmax.f32 %v123_v14, 0.0 }
 0x117   :  { %v128_v18 = vpack.c.bf16 %v127_v17, %v126_v16 }
 0x119   :  { %281 = vmatmul.mubr.msk.bf16.vlgmr.msra.gmra.mrb[0].mxu1 %vm168_vm2, %v128_v18 }
 0x1ec   :  { %v206_v20 = vpop.f32.mrb[0].mxu1 }
 0x1ed   :  { %v282_v21 = vpop.f32.mrb[1].mxu1  ;;  %v207_v23 = vadd.f32 %v244_v19, %v206_v20 }
 0x1ee   :  { %v209_v22 = vpop.f32.mrb[2].mxu1 }
 0x1ef   :  { %v210_v24 = vadd.f32 %v244_v19, %v209_v22  ;;  %v283_v25 = vpop.f32.mrb[3].mxu1 }
 0x1f1   :  { %v257_v26 = vpack.c.bf16 %v210_v24, %v207_v23 }
 0x1f3   :  { %258 = vst [vmem:[#allocation8] sm:$0xff] %v257_v26  }
 0x1f4   :  { %376 = shalt.err (!%p373_p0)
}
 0x1f5   :  { %s377_s14 = scalar_lea.hbm %s501_s5, 128 }
 0x1f6   :  { %p378_p1 = scmp.ne.s32.totalorder %s501_s5, %s377_s14  ;;  %p381_p2 = scmp.lt.u32.totalorder %s377_s14, %s501_s5 }
 0x1f8   :  { %p383_p3 = pnand %p381_p2, %p378_p1 }
 0x1fa   :  { %386 = shalt.err (!%p383_p3)
}
 0x1fb   :  { %234 = dma.vmem_to_hbm [thread:$0]  %s229_s2, 128, %s501_s5, [#allocation4], %s394_s28, %s394_s28, %s395_s29  }
 0x1fc   :  { %391 = dma.done.wait [#allocation4], 128  }
 0x1fd   :  { %392 = vsyncadd [#allocation4], 4294967168 }
 0x1fe   :  { %238 = vsyncpa [#allocation3], 1 }
 0x1ff   :  { %239 = vsyncpa [#allocation6], 1 }
 0x200   :  { %240 = vsyncpa [#allocation4], 1 }

// kernel: tpu_custom_call.1
= control target key start
LH: loop header
LB: loop body
LE: loop exit
PB: predicated region body
PF: predicated region fallthrough
CT: control target
= control target key end

     0   :  { %10 = vsyncpa [#allocation3], 0  ;;  %s496_s0 = inlined_call_operand.hbm [shape: f32[16,16], index: 0, kind: input, shape index: {}]   ;;  %s497_s1 = inlined_call_operand.hbm [shape: bf16[16,64], index: 1, kind: input, shape index: {}]   ;;  %s498_s2 = inlined_call_operand.vmem [shape: f32[1,64], index: 2, kind: input, shape index: {}]   ;;  %s499_s3 = inlined_call_operand.hbm [shape: bf16[64,128], index: 3, kind: input, shape index: {}]   ;;  %s500_s4 = inlined_call_operand.vmem [shape: f32[1,128], index: 4, kind: input, shape index: {}]   ;;  %s501_s5 = inlined_call_operand.hbm [shape: bf16[16,128], index: 5, kind: output, shape index: {}]  }
   0x1   :  { %11 = vsyncpa [#allocation6], 0 }
   0x2   :  { %12 = vsyncpa [#allocation4], 0  ;;  %s393_s18 = smov [#allocation5]   ;;  %s299_s22 = scalar_lea.hbm %s497_s1, 128 }
   0x3   :  { %s30_s19 = sshll.u32 %s393_s18, 4  ;;  %p300_p0 = scmp.ne.s32.totalorder %s497_s1, %s299_s22  ;;  %s31_s19 = int_to_ptr.vmem [resolvable:$true] %s30_s19 }
   0x4   :  { %p303_p1 = scmp.lt.u32.totalorder %s299_s22, %s497_s1 }
   0x6   :  { %p305_p2 = pnand %p303_p1, %p300_p0 }
   0x8   :  { %308 = shalt.err (!%p305_p2)
}
   0x9   :  { %s309_s27 = scalar_lea.vmem %s31_s19, 128  ;;  %p314_p4 = scmp.lt.s32.totalorder %s31_s19, %s31_s19 }
   0xa   :  { %p310_p3 = scmp.ne.s32.totalorder %s31_s19, %s309_s27  ;;  %p315_p5 = scmp.lt.s32.totalorder %s309_s27, %s309_s27 }
   0xc   :  { %p316_p6 = por %p315_p5, %p314_p4 }
   0xe   :  { %p317_p7 = pnand %p316_p6, %p310_p3 }
  0x10   :  { %320 = shalt.err (!%p317_p7)
}
  0x11   :  { %s394_s28 = smov 64   ;;  %s395_s29 = smov 4  }
  0x12   :  { %36 = dma.hbm_to_vmem [thread:$0]  %s497_s1, 128, %s31_s19, [#allocation6], %s394_s28, %s394_s28, %s395_s29  }
  0x13   :  { %s396_s7 = smov [#allocation2]   ;;  %s321_s11 = scalar_lea.hbm %s496_s0, 256 }
  0x14   :  { %s18_s8 = sshll.u32 %s396_s7, 4  ;;  %p322_p8 = scmp.ne.s32.totalorder %s496_s0, %s321_s11  ;;  %s19_s8 = int_to_ptr.vmem [resolvable:$true] %s18_s8 }
  0x15   :  { %p325_p9 = scmp.lt.u32.totalorder %s321_s11, %s496_s0 }
  0x17   :  { %p327_p10 = pnand %p325_p9, %p322_p8 }
  0x19   :  { %330 = shalt.err (!%p327_p10)
}
  0x1a   :  { %s331_s16 = scalar_lea.vmem %s19_s8, 256  ;;  %p336_p12 = scmp.lt.s32.totalorder %s19_s8, %s19_s8 }
  0x1b   :  { %p332_p11 = scmp.ne.s32.totalorder %s19_s8, %s331_s16  ;;  %p337_p13 = scmp.lt.s32.totalorder %s331_s16, %s331_s16 }
  0x1d   :  { %p338_p0 = por %p337_p13, %p336_p12 }
  0x1f   :  { %p339_p1 = pnand %p338_p0, %p332_p11 }
  0x21   :  { %342 = shalt.err (!%p339_p1)
}
  0x22   :  { %s397_s1 = smov 128   ;;  %s398_s17 = smov 8  }
  0x23   :  { %24 = dma.hbm_to_vmem [thread:$0]  %s496_s0, 256, %s19_s8, [#allocation3], %s397_s1, %s397_s1, %s398_s17  }
  0x24   :  { %s399_s20 = smov [#allocation7]   ;;  %s343_s24 = scalar_lea.hbm %s499_s3, 512 }
  0x25   :  { %s44_s21 = sshll.u32 %s399_s20, 4  ;;  %p344_p2 = scmp.ne.s32.totalorder %s499_s3, %s343_s24  ;;  %s45_s21 = int_to_ptr.vmem [resolvable:$true] %s44_s21 }
  0x26   :  { %p347_p3 = scmp.lt.u32.totalorder %s343_s24, %s499_s3 }
  0x28   :  { %p349_p4 = pnand %p347_p3, %p344_p2 }
  0x2a   :  { %352 = shalt.err (!%p349_p4)
}
  0x2b   :  { %s353_s6 = scalar_lea.vmem %s45_s21, 512  ;;  %p358_p6 = scmp.lt.s32.totalorder %s45_s21, %s45_s21 }
  0x2c   :  { %p354_p5 = scmp.ne.s32.totalorder %s45_s21, %s353_s6  ;;  %p359_p7 = scmp.lt.s32.totalorder %s353_s6, %s353_s6 }
  0x2e   :  { %p360_p8 = por %p359_p7, %p358_p6 }
  0x30   :  { %p361_p9 = pnand %p360_p8, %p354_p5 }
  0x32   :  { %364 = shalt.err (!%p361_p9)
}
  0x33   :  { %50 = dma.hbm_to_vmem [thread:$0]  %s499_s3, 512, %s45_s21, [#allocation6], %s394_s28, %s394_s28, %s395_s29  }
  0x34   :  { %387 = dma.done.wait [#allocation3], 256  }
  0x35   :  { %388 = vsyncadd [#allocation3], 4294967040 }
  0x36   :  { %389 = dma.done.wait [#allocation6], 640  }
  0x37   :  { %390 = vsyncadd [#allocation6], 4294966656  ;;  %v400_v0 = vmov 0.0   ;;  %vm401_vm0 = vmmov 0   ;;  %v294_v1 = vld [vmem:[#allocation5] sm:$0xff]   ;;  %v63_v2 = vld [vmem:[#allocation2] sm:$0xff] }
  0x38   :  { %266 = vmatprep.subr.bf16.mxu0 %v400_v0  ;;  %268 = vmatprep.mubr.msk.bf16.mxu0 %vm401_vm0, %v400_v0  ;;  %v64_v3 = vld [vmem:[#allocation2 + $0x8] sm:$0xff]  ;;  %vm81_vm1 = vcmask 130048   ;;  %v295_v5 = vld [vmem:[#allocation7] sm:$0xff]   ;;  %v296_v6 = vld [vmem:[#allocation7 + $0x8] sm:$0xff]   ;;  %vm168_vm2 = vcmask 523264   ;;  %s402_s11 = smov [#allocation8]  }
  0x39   :  { %272 = vmatprep.subr.bf16.mxu1 %v400_v0  ;;  %280 = vmatprep.mubr.msk.bf16.mxu1 %vm401_vm0, %v400_v0  ;;  %v65_v4 = vpack.c.bf16 %v64_v3, %v63_v2  ;;  %v297_v7 = vld [vmem:[#allocation7 + $0x10] sm:$0xff]   ;;  %v298_v8 = vld [vmem:[#allocation7 + $0x18] sm:$0xff]   ;;  %v241_v9 = vld [vmem:[%s498_s2] ss:$0 sm:$0xff]  ;;  %s228_s2 = sshll.u32 %s402_s11, 4  ;;  %s229_s2 = int_to_ptr.vmem [resolvable:$true] %s228_s2 }
  0x3a   :  { %267 = vmatpush3.bf16.msra.mxu0 %v294_v1  ;;  %273 = vmatpush3.bf16.msra.mxu1 %v295_v5  ;;  %v244_v19 = vld [vmem:[%s500_s4] ss:$0 sm:$0xff]  ;;  %s365_s12 = scalar_lea.vmem %s229_s2, 128  ;;  %p370_p11 = scmp.lt.s32.totalorder %s229_s2, %s229_s2 }
  0x3b   :  { %274 = vmatprep.subr.bf16.mxu1 %v400_v0  ;;  %p366_p10 = scmp.ne.s32.totalorder %s229_s2, %s365_s12  ;;  %p371_p12 = scmp.lt.s32.totalorder %s365_s12, %s365_s12 }
  0x3d   :  { %269 = vmatmul.mubr.msk.bf16.vlgmr.msra.gmra.mrb[0].mxu0 %vm81_vm1, %v65_v4  ;;  %p372_p13 = por %p371_p12, %p370_p11 }
  0x3e   :  { %275 = vmatpush3.bf16.msra.mxu1 %v296_v6 }
  0x3f   :  { %276 = vmatprep.subr.bf16.mxu1 %v400_v0  ;;  %p373_p0 = pnand %p372_p13, %p366_p10 }
  0x42   :  { %277 = vmatpush3.bf16.msra.mxu1 %v297_v7 }
  0x43   :  { %278 = vmatprep.subr.bf16.mxu1 %v400_v0 }
  0x46   :  { %279 = vmatpush3.bf16.msra.mxu1 %v298_v8 }
 0x110   :  { %v119_v10 = vpop.f32.mrb[0].mxu0 }
 0x111   :  { %v120_v11 = vadd.f32 %v241_v9, %v119_v10  ;;  %v270_v12 = vpop.f32.mrb[1].mxu0 }
 0x112   :  { %v122_v13 = vpop.f32.mrb[2].mxu0 }
 0x113   :  { %v123_v14 = vadd.f32 %v241_v9, %v122_v13  ;;  %v271_v15 = vpop.f32.mrb[3].mxu0  ;;  %v126_v16 = vmax.f32 %v120_v11, 0.0 }
 0x115   :  { %v127_v17 = vmax.f32 %v123_v14, 0.0 }
 0x117   :  { %v128_v18 = vpack.c.bf16 %v127_v17, %v126_v16 }
 0x119   :  { %281 = vmatmul.mubr.msk.bf16.vlgmr.msra.gmra.mrb[0].mxu1 %vm168_vm2, %v128_v18 }
 0x1ec   :  { %v206_v20 = vpop.f32.mrb[0].mxu1 }
 0x1ed   :  { %v282_v21 = vpop.f32.mrb[1].mxu1  ;;  %v207_v23 = vadd.f32 %v244_v19, %v206_v20 }
 0x1ee   :  { %v209_v22 = vpop.f32.mrb[2].mxu1 }
 0x1ef   :  { %v210_v24 = vadd.f32 %v244_v19, %v209_v22  ;;  %v283_v25 = vpop.f32.mrb[3].mxu1 }
 0x1f1   :  { %v257_v26 = vpack.c.bf16 %v210_v24, %v207_v23 }
 0x1f3   :  { %258 = vst [vmem:[#allocation8] sm:$0xff] %v257_v26  }
 0x1f4   :  { %376 = shalt.err (!%p373_p0)
}
 0x1f5   :  { %s377_s14 = scalar_lea.hbm %s501_s5, 128 }
 0x1f6   :  { %p378_p1 = scmp.ne.s32.totalorder %s501_s5, %s377_s14  ;;  %p381_p2 = scmp.lt.u32.totalorder %s377_s14, %s501_s5 }
 0x1f8   :  { %p383_p3 = pnand %p381_p2, %p378_p1 }
 0x1fa   :  { %386 = shalt.err (!%p383_p3)
}
 0x1fb   :  { %234 = dma.vmem_to_hbm [thread:$0]  %s229_s2, 128, %s501_s5, [#allocation4], %s394_s28, %s394_s28, %s395_s29  }
 0x1fc   :  { %391 = dma.done.wait [#allocation4], 128  }
 0x1fd   :  { %392 = vsyncadd [#allocation4], 4294967168 }
 0x1fe   :  { %238 = vsyncpa [#allocation3], 1 }
 0x1ff   :  { %239 = vsyncpa [#allocation6], 1 }
 0x200   :  { %240 = vsyncpa [#allocation4], 1 }

</bundles_post_ra>
